<compile_context>
chip_gen: v7x
topology: tpu7x:2x2x1
jax: 0.10.0
libtpu: 0.0.40
codegen_flags: <defaults>
</compile_context>

<pallas_src>
import functools

import jax
import jax.numpy as jnp
from jax import lax
from jax.experimental import pallas as pl
from jax.experimental.pallas import tpu as pltpu

TEMPERATURE = 0.07
INV_TEMP = 1.0 / TEMPERATURE
EPS = 1e-12          # torch F.normalize eps
SUBLANES = 8         # f32 sublane tile rows
MIB = 1 << 20


def _cdiv(a, b):
    return -(-a // b)


def _vmem_capacity_bytes():
    try:
        return int(pltpu.get_tpu_info().vmem_capacity_bytes)
    except Exception:
        return 64 * MIB          # conservative fallback: v7x per-TensorCore VMEM


def _plan_stream(batch, seq, hidden, itemsize, seq_tile):
    """Choose (TS, n_par, tiles_per_part, ragged, acc_rows, vmem_limit_bytes)."""
    # dtype-aware sublane granule: bf16 packs 2 rows per sublane, int8 packs 4.
    granule = {4: 8, 2: 16, 1: 32}.get(itemsize, 8)

    cap = _vmem_capacity_bytes()
    hard_limit = min(cap * 3 // 4, 100 * MIB)   # ~96 MiB on 128 MiB parts, ~48 MiB on v7x
    # Resident besides the streamed tiles: the two (1, B, 8, H) f32 partial-sum
    # output blocks (+ one pipelining copy each) and compiler-internal scratch.
    resident = 2 * 2 * batch * SUBLANES * hidden * 4
    budget = max(hard_limit - resident - 4 * MIB, MIB)

    if seq_tile is not None:                    # explicit override (testing / tuning)
        ts = min(int(seq_tile), seq)
        if ts < seq:
            ts = max(granule, (ts // granule) * granule)
    else:
        per_row = 2 * 2 * batch * hidden * itemsize   # 2 streams x double buffer
        ts = max(granule, (budget // per_row) // granule * granule)

    if ts >= seq:
        ts = seq                                # full-dim block (exempt from 8-row rule)
        n_tiles = 1
    else:
        n_tiles = _cdiv(seq, ts)

    n_par = 2 if n_tiles >= 2 else 1            # split the reduction across v7x cores
    tiles_per_part = _cdiv(n_tiles, n_par)
    ragged = (n_par * tiles_per_part * ts) != seq
    acc_rows = SUBLANES if ts % SUBLANES == 0 else 1

    # Request only the scoped VMEM this kernel actually needs (never above hard_limit).
    need = 2 * 2 * batch * ts * hidden * itemsize + resident + 4 * MIB
    vmem_limit = int(min(hard_limit, max(need, 8 * MIB)))
    return ts, n_par, tiles_per_part, ragged, acc_rows, vmem_limit


def _seq_sum_kernel(anchor_ref, pos_ref, sumq_ref, sumk_ref, *,
                    ts, acc_rows, seq_len, tiles_per_part, ragged):
    """Streams (B, TS, H) tiles and accumulates sublane-aligned sequence sums."""
    s = pl.program_id(1)

    @pl.when(s == 0)
    def _init():
        sumq_ref[...] = jnp.zeros_like(sumq_ref)
        sumk_ref[...] = jnp.zeros_like(sumk_ref)

    if ragged:
        row0 = (pl.program_id(0) * tiles_per_part + s) * ts
        rows = row0 + lax.broadcasted_iota(jnp.int32, (ts, 1), 0)
        keep = rows < seq_len                    # (TS, 1), broadcasts over (B, TS, H)

    def tile_partial_sum(ref):
        x = ref[...].astype(jnp.float32)         # (B, TS, H); accumulate in f32
        if ragged:
            # jnp.where (select), NOT a multiplicative mask: the out-of-bounds rows
            # of a boundary tile hold undefined VMEM bytes (possibly NaN) which a
            # multiply would propagate.
            x = jnp.where(keep, x, 0.0)
        b, _, h = x.shape
        if acc_rows == 1:                        # TS == S and S % 8 != 0 (single step)
            return jnp.sum(x, axis=1, keepdims=True)                       # (B, 1, H)
        # Sublane-aligned partial sums: reduce only over the group axis so the hot
        # loop is pure vreg-aligned adds (no per-step cross-sublane relayout).
        return jnp.sum(x.reshape(b, ts // acc_rows, acc_rows, h), axis=1)  # (B, 8, H)

    sumq_ref[...] += tile_partial_sum(anchor_ref)[None]
    sumk_ref[...] += tile_partial_sum(pos_ref)[None]


def _epilogue_kernel(sumq_ref, sumk_ref, wq_ref, bq_ref, wk_ref, bk_ref,
                     loss_ref, embq_ref, embk_ref, *, seq_len):
    """One-shot projection + normalize + in-batch InfoNCE on the (n_par,B,8,H) sums."""
    inv_seq = jnp.float32(1.0 / seq_len)

    def project_normalize(sum_ref, w_ref, b_ref):
        # The single cross-sublane reduce of the whole forward happens here, once.
        total = jnp.sum(sum_ref[...], axis=0).sum(axis=1)                  # (B, H)
        mean = total * inv_seq
        # mean(seq) @ W + b  ==  mean(seq @ W + b)   (exact by linearity)
        emb = jnp.dot(mean, w_ref[...],
                      preferred_element_type=jnp.float32) + b_ref[...]     # (B, D)
        ss = jnp.sum(emb * emb, axis=-1, keepdims=True)
        # == emb / max(||emb||, eps)  (torch F.normalize); rsqrt rides the EUP.
        return emb * lax.rsqrt(jnp.maximum(ss, EPS * EPS))

    emb_q = project_normalize(sumq_ref, wq_ref, bq_ref)    # query encoder
    emb_k = project_normalize(sumk_ref, wk_ref, bk_ref)    # key (momentum) encoder
    embq_ref[...] = emb_q
    embk_ref[...] = emb_k

    # criterion(emb_q, emb_k, queue=None): in-batch InfoNCE, positives on the diagonal.
    logits = jnp.dot(emb_q, emb_k.T,
                     preferred_element_type=jnp.float32) * INV_TEMP        # (B, B)
    pos_logit = jnp.sum(emb_q * emb_k, axis=-1, keepdims=True) * INV_TEMP  # diag, no iota
    m = jnp.max(logits, axis=-1, keepdims=True)
    lse = m + jnp.log(jnp.sum(jnp.exp(logits - m), axis=-1, keepdims=True))
    loss_ref[...] = jnp.full((1, 1), jnp.mean(lse - pos_logit), dtype=jnp.float32)


@functools.partial(jax.jit, static_argnames=("seq_tile",))
def retrieval_forward(anchor, positive, wq, bq, wk, bk, *, seq_tile=None):
    """seq2vec(anchor/positive) -> L2-normalized embeddings -> InfoNCE loss.

    anchor/positive: (B, S, H) pre-extracted hidden states (f32 or bf16), streamed
    as-is (no pad / cast copy).  wq/wk: (H, D); bq/bk: (1, D).
    """
    assert anchor.ndim == 3 and anchor.shape == positive.shape
    B, S, H = anchor.shape
    Hw, D = wq.shape
    assert Hw == H

    itemsize = jnp.dtype(anchor.dtype).itemsize
    ts, n_par, tiles_per_part, ragged, acc_rows, vmem_limit = _plan_stream(
        B, S, H, itemsize, seq_tile)

    seq_spec = pl.BlockSpec((B, ts, H), lambda p, s: (0, p * tiles_per_part + s, 0))
    sum_spec = pl.BlockSpec((1, B, acc_rows, H), lambda p, s: (p, 0, 0, 0))
    sum_shape = jax.ShapeDtypeStruct((n_par, B, acc_rows, H), jnp.float32)

    # --- streaming pass: sequence-sum reduction only (weights never resident) ---
    sum_q, sum_k = pl.pallas_call(
        functools.partial(_seq_sum_kernel, ts=ts, acc_rows=acc_rows, seq_len=S,
                          tiles_per_part=tiles_per_part, ragged=ragged),
        out_shape=(sum_shape, sum_shape),
        grid_spec=pltpu.PrefetchScalarGridSpec(
            num_scalar_prefetch=0,
            grid=(n_par, tiles_per_part),
            in_specs=[seq_spec, seq_spec],
            out_specs=(sum_spec, sum_spec),
        ),
        compiler_params=pltpu.CompilerParams(
            dimension_semantics=("parallel", "arbitrary"),   # cores x reduction
            vmem_limit_bytes=vmem_limit,
        ),
    )(anchor, positive)

    # --- tiny epilogue: projection + normalize + InfoNCE (single invocation) ---
    loss, emb_q, emb_k = pl.pallas_call(
        functools.partial(_epilogue_kernel, seq_len=S),
        out_shape=(
            jax.ShapeDtypeStruct((1, 1), jnp.float32),
            jax.ShapeDtypeStruct((B, D), jnp.float32),
            jax.ShapeDtypeStruct((B, D), jnp.float32),
        ),
    )(sum_q, sum_k,
      wq.astype(jnp.float32), bq.astype(jnp.float32),
      wk.astype(jnp.float32), bk.astype(jnp.float32))

    return loss[0, 0], emb_q, emb_k


def dequeue_and_enqueue(queue, queue_ptr, keys):
    # _dequeue_and_enqueue: plain-JAX buffer bookkeeping (not a hot path).
    dim, queue_size = queue.shape
    batch = keys.shape[0]
    if queue_size % batch == 0:
        queue = lax.dynamic_update_slice(queue, keys.T, (0, queue_ptr))
        queue_ptr = (queue_ptr + batch) % queue_size
    return queue, queue_ptr


if __name__ == "__main__":
    B, S, H, D = 4, 56, 128, 32        # batch, seq_len, hidden (BERT-ish), loss_config['dim']
    QUEUE_SIZE = 8                     # loss_config['queue_size'] (multiple of B)

    key = jax.random.PRNGKey(0)
    k1, k2, k3, k4 = jax.random.split(key, 4)

    # pre-extracted BERT last_hidden_state for anchor / positive samples
    anchor_sample = jax.random.normal(k1, (B, S, H), jnp.float32)
    positive_sample = jax.random.normal(k2, (B, S, H), jnp.float32)

    # encoder_q params; encoder_k initialized as an exact copy (momentum-encoder init)
    wq = 0.05 * jax.random.normal(k3, (H, D), jnp.float32)
    bq = jnp.zeros((1, D), jnp.float32)
    wk, bk = wq, bq

    # queue buffer: randn(dim, queue_size) normalized along dim 0
    queue = jax.random.normal(k4, (D, QUEUE_SIZE), jnp.float32)
    queue = queue / jnp.maximum(jnp.linalg.norm(queue, axis=0, keepdims=True), EPS)
    queue_ptr = 0

    # seq_tile=16 forces a (2 parallel parts) x (2 sequence tiles) grid with a ragged
    # last tile, so the multi-step accumulation, core-split and tail-mask paths are
    # all exercised even at these small demo shapes.
    loss, emb_q, emb_k = retrieval_forward(anchor_sample, positive_sample,
                                           wq, bq, wk, bk, seq_tile=16)
    queue, queue_ptr = dequeue_and_enqueue(queue, queue_ptr, emb_k)
    jax.block_until_ready((loss, emb_q, emb_k, queue))

    # Pure-JAX reference of the same forward (linear stand-in encoder, queue=None).
    def _reference(a, p, wq_, bq_, wk_, bk_):
        def enc(x, w, b):
            e = x.mean(axis=1) @ w + b
            return e / jnp.maximum(jnp.linalg.norm(e, axis=-1, keepdims=True), EPS)
        eq, ek = enc(a, wq_, bq_), enc(p, wk_, bk_)
        lg = (eq @ ek.T) * INV_TEMP
        m = jnp.max(lg, axis=-1)
        lse = m + jnp.log(jnp.sum(jnp.exp(lg - m[:, None]), axis=-1))
        pos = jnp.sum(eq * ek, axis=-1) * INV_TEMP
        return jnp.mean(lse - pos), eq, ek

    ref_loss, ref_q, ref_k = _reference(anchor_sample, positive_sample, wq, bq, wk, bk)
    assert jnp.allclose(loss, ref_loss, atol=2e-3, rtol=2e-3)
    assert jnp.allclose(emb_q, ref_q, atol=2e-3)
    assert jnp.allclose(emb_k, ref_k, atol=2e-3)

    print("KERNEL_OK")
</pallas_src>

<mosaic_0001>
module attributes {stable_mosaic.version = 11 : i64} {
  func.func @_seq_sum_kernel(%arg0: i32, %arg1: i32, %arg2: memref<4x16x128xf32, #tpu.memory_space<vmem>>, %arg3: memref<4x16x128xf32, #tpu.memory_space<vmem>>, %arg4: memref<1x4x8x128xf32, #tpu.memory_space<vmem>>, %arg5: memref<1x4x8x128xf32, #tpu.memory_space<vmem>>) attributes {dimension_semantics = [#tpu.dimension_semantics<parallel>, #tpu.dimension_semantics<arbitrary>], iteration_bounds = array<i64: 2, 2>, scalar_prefetch = 0 : i64, scratch_operands = 0 : i64, tpu.core_type = #tpu.core_type<tc>, window_params = [{transform_indices = @transform_0, window_bounds = array<i64: 4, 16, 128>}, {transform_indices = @transform_1, window_bounds = array<i64: 4, 16, 128>}, {transform_indices = @transform_2, window_bounds = array<i64: 1, 4, 8, 128>}, {transform_indices = @transform_3, window_bounds = array<i64: 1, 4, 8, 128>}]} {
    %c0_i32 = arith.constant 0 : i32
    %0 = arith.cmpi eq, %arg1, %c0_i32 : i32
    %1 = arith.extui %0 : i1 to i32
    %c0_i32_0 = arith.constant 0 : i32
    %2 = arith.cmpi ne, %1, %c0_i32_0 : i32
    scf.if %2 {
      %cst_25 = arith.constant 0.000000e+00 : f32
      %33 = vector.broadcast %cst_25 : f32 to vector<1x4x8x128xf32>
      %c0_26 = arith.constant 0 : index
      %c0_27 = arith.constant 0 : index
      %c0_28 = arith.constant 0 : index
      %c0_29 = arith.constant 0 : index
      %34 = vector.load %arg4[%c0_26, %c0_27, %c0_28, %c0_29] : memref<1x4x8x128xf32, #tpu.memory_space<vmem>>, vector<1x4x8x128xf32>
      tpu.vector_store %arg4[%c0_26, %c0_27, %c0_28, %c0_29], %33 {strides = array<i32>} : memref<1x4x8x128xf32, #tpu.memory_space<vmem>>, vector<1x4x8x128xf32>,
      %cst_30 = arith.constant 0.000000e+00 : f32
      %35 = vector.broadcast %cst_30 : f32 to vector<1x4x8x128xf32>
      %c0_31 = arith.constant 0 : index
      %c0_32 = arith.constant 0 : index
      %c0_33 = arith.constant 0 : index
      %c0_34 = arith.constant 0 : index
      %36 = vector.load %arg5[%c0_31, %c0_32, %c0_33, %c0_34] : memref<1x4x8x128xf32, #tpu.memory_space<vmem>>, vector<1x4x8x128xf32>
      tpu.vector_store %arg5[%c0_31, %c0_32, %c0_33, %c0_34], %35 {strides = array<i32>} : memref<1x4x8x128xf32, #tpu.memory_space<vmem>>, vector<1x4x8x128xf32>,
    } else {
    }
    %c2_i32 = arith.constant 2 : i32
    %3 = arith.muli %arg0, %c2_i32 : i32
    %4 = arith.addi %3, %arg1 : i32
    %c16_i32 = arith.constant 16 : i32
    %5 = arith.muli %4, %c16_i32 : i32
    %6 = tpu.iota {dimensions = array<i32: 0>} : vector<16x1xi32>
    %7 = vector.broadcast %5 : i32 to vector<16x1xi32>
    %8 = arith.addi %7, %6 : vector<16x1xi32>
    %c56_i32 = arith.constant 56 : i32
    %9 = vector.broadcast %c56_i32 : i32 to vector<16x1xi32>
    %10 = arith.cmpi slt, %8, %9 : vector<16x1xi32>
    %c0 = arith.constant 0 : index
    %c0_1 = arith.constant 0 : index
    %c0_2 = arith.constant 0 : index
    %c0_3 = arith.constant 0 : index
    %11 = vector.load %arg4[%c0, %c0_1, %c0_2, %c0_3] : memref<1x4x8x128xf32, #tpu.memory_space<vmem>>, vector<1x4x8x128xf32>
    %c0_4 = arith.constant 0 : index
    %c0_5 = arith.constant 0 : index
    %c0_6 = arith.constant 0 : index
    %12 = vector.load %arg2[%c0_4, %c0_5, %c0_6] : memref<4x16x128xf32, #tpu.memory_space<vmem>>, vector<4x16x128xf32>
    %cst = arith.constant 0.000000e+00 : f32
    %13 = vector.shape_cast %10 : vector<16x1xi1> to vector<1x16x1xi1>
    %14 = vector.broadcast %13 : vector<1x16x1xi1> to vector<4x16x128xi1>
    %15 = vector.broadcast %cst : f32 to vector<4x16x128xf32>
    %16 = arith.select %14, %12, %15 : vector<4x16x128xi1>, vector<4x16x128xf32>
    %17 = vector.shape_cast %16 : vector<4x16x128xf32> to vector<4x2x8x128xf32>
    %cst_7 = arith.constant dense<0.000000e+00> : vector<4x8x128xf32>
    %18 = vector.multi_reduction <add>, %17, %cst_7 [1] : vector<4x2x8x128xf32> to vector<4x8x128xf32>
    %19 = vector.shape_cast %18 : vector<4x8x128xf32> to vector<1x4x8x128xf32>
    %20 = arith.addf %11, %19 : vector<1x4x8x128xf32>
    %c0_8 = arith.constant 0 : index
    %c0_9 = arith.constant 0 : index
    %c0_10 = arith.constant 0 : index
    %c0_11 = arith.constant 0 : index
    %21 = vector.load %arg4[%c0_8, %c0_9, %c0_10, %c0_11] : memref<1x4x8x128xf32, #tpu.memory_space<vmem>>, vector<1x4x8x128xf32>
    tpu.vector_store %arg4[%c0_8, %c0_9, %c0_10, %c0_11], %20 {strides = array<i32>} : memref<1x4x8x128xf32, #tpu.memory_space<vmem>>, vector<1x4x8x128xf32>,
    %c0_12 = arith.constant 0 : index
    %c0_13 = arith.constant 0 : index
    %c0_14 = arith.constant 0 : index
    %c0_15 = arith.constant 0 : index
    %22 = vector.load %arg5[%c0_12, %c0_13, %c0_14, %c0_15] : memref<1x4x8x128xf32, #tpu.memory_space<vmem>>, vector<1x4x8x128xf32>
    %c0_16 = arith.constant 0 : index
    %c0_17 = arith.constant 0 : index
    %c0_18 = arith.constant 0 : index
    %23 = vector.load %arg3[%c0_16, %c0_17, %c0_18] : memref<4x16x128xf32, #tpu.memory_space<vmem>>, vector<4x16x128xf32>
    %cst_19 = arith.constant 0.000000e+00 : f32
    %24 = vector.shape_cast %10 : vector<16x1xi1> to vector<1x16x1xi1>
    %25 = vector.broadcast %24 : vector<1x16x1xi1> to vector<4x16x128xi1>
    %26 = vector.broadcast %cst_19 : f32 to vector<4x16x128xf32>
    %27 = arith.select %25, %23, %26 : vector<4x16x128xi1>, vector<4x16x128xf32>
    %28 = vector.shape_cast %27 : vector<4x16x128xf32> to vector<4x2x8x128xf32>
    %cst_20 = arith.constant dense<0.000000e+00> : vector<4x8x128xf32>
    %29 = vector.multi_reduction <add>, %28, %cst_20 [1] : vector<4x2x8x128xf32> to vector<4x8x128xf32>
    %30 = vector.shape_cast %29 : vector<4x8x128xf32> to vector<1x4x8x128xf32>
    %31 = arith.addf %22, %30 : vector<1x4x8x128xf32>
    %c0_21 = arith.constant 0 : index
    %c0_22 = arith.constant 0 : index
    %c0_23 = arith.constant 0 : index
    %c0_24 = arith.constant 0 : index
    %32 = vector.load %arg5[%c0_21, %c0_22, %c0_23, %c0_24] : memref<1x4x8x128xf32, #tpu.memory_space<vmem>>, vector<1x4x8x128xf32>
    tpu.vector_store %arg5[%c0_21, %c0_22, %c0_23, %c0_24], %31 {strides = array<i32>} : memref<1x4x8x128xf32, #tpu.memory_space<vmem>>, vector<1x4x8x128xf32>,
    return
  }
  func.func @transform_0(%arg0: i32, %arg1: i32) -> (i32, i32, i32) {
    %c2_i32 = arith.constant 2 : i32
    %0 = arith.muli %arg0, %c2_i32 : i32
    %1 = arith.addi %0, %arg1 : i32
    %c0_i32 = arith.constant 0 : i32
    %c0_i32_0 = arith.constant 0 : i32
    %c0_i32_1 = arith.constant 0 : i32
    return %c0_i32, %1, %c0_i32_0 : i32, i32, i32
  }
  func.func @transform_1(%arg0: i32, %arg1: i32) -> (i32, i32, i32) {
    %c2_i32 = arith.constant 2 : i32
    %0 = arith.muli %arg0, %c2_i32 : i32
    %1 = arith.addi %0, %arg1 : i32
    %c0_i32 = arith.constant 0 : i32
    %c0_i32_0 = arith.constant 0 : i32
    %c0_i32_1 = arith.constant 0 : i32
    return %c0_i32, %1, %c0_i32_0 : i32, i32, i32
  }
  func.func @transform_2(%arg0: i32, %arg1: i32) -> (i32, i32, i32, i32) {
    %c0_i32 = arith.constant 0 : i32
    %c0_i32_0 = arith.constant 0 : i32
    %c0_i32_1 = arith.constant 0 : i32
    %c0_i32_2 = arith.constant 0 : i32
    return %arg0, %c0_i32, %c0_i32_0, %c0_i32_1 : i32, i32, i32, i32
  }
  func.func @transform_3(%arg0: i32, %arg1: i32) -> (i32, i32, i32, i32) {
    %c0_i32 = arith.constant 0 : i32
    %c0_i32_0 = arith.constant 0 : i32
    %c0_i32_1 = arith.constant 0 : i32
    %c0_i32_2 = arith.constant 0 : i32
    return %arg0, %c0_i32, %c0_i32_0, %c0_i32_1 : i32, i32, i32, i32
  }
}

module attributes {stable_mosaic.version = 11 : i64} {
  func.func @_epilogue_kernel(%arg0: memref<2x4x8x128xf32, #tpu.memory_space<vmem>>, %arg1: memref<2x4x8x128xf32, #tpu.memory_space<vmem>>, %arg2: memref<128x32xf32, #tpu.memory_space<vmem>>, %arg3: memref<1x32xf32, #tpu.memory_space<vmem>>, %arg4: memref<128x32xf32, #tpu.memory_space<vmem>>, %arg5: memref<1x32xf32, #tpu.memory_space<vmem>>, %arg6: memref<1x1xf32, #tpu.memory_space<vmem>>, %arg7: memref<4x32xf32, #tpu.memory_space<vmem>>, %arg8: memref<4x32xf32, #tpu.memory_space<vmem>>) attributes {dimension_semantics = [], scalar_prefetch = 0 : i64, scratch_operands = 0 : i64, tpu.core_type = #tpu.core_type<tc>} {
    %c0 = arith.constant 0 : index
    %c0_0 = arith.constant 0 : index
    %c0_1 = arith.constant 0 : index
    %c0_2 = arith.constant 0 : index
    %0 = vector.load %arg0[%c0, %c0_0, %c0_1, %c0_2] : memref<2x4x8x128xf32, #tpu.memory_space<vmem>>, vector<2x4x8x128xf32>
    %cst = arith.constant dense<0.000000e+00> : vector<4x8x128xf32>
    %1 = vector.multi_reduction <add>, %0, %cst [0] : vector<2x4x8x128xf32> to vector<4x8x128xf32>
    %cst_3 = arith.constant dense<0.000000e+00> : vector<4x128xf32>
    %2 = vector.multi_reduction <add>, %1, %cst_3 [1] : vector<4x8x128xf32> to vector<4x128xf32>
    %cst_4 = arith.constant 0.0178571437 : f32
    %3 = vector.broadcast %cst_4 : f32 to vector<4x128xf32>
    %4 = arith.mulf %2, %3 : vector<4x128xf32>
    %c0_5 = arith.constant 0 : index
    %c0_6 = arith.constant 0 : index
    %5 = vector.load %arg2[%c0_5, %c0_6] : memref<128x32xf32, #tpu.memory_space<vmem>>, vector<128x32xf32>
    %cst_7 = arith.constant dense<0.000000e+00> : vector<4x32xf32>
    %6 = tpu.matmul %4, %5, %cst_7 {dimension_numbers = #tpu.dot_dimension_numbers<[1], [0], [0], [1], [0, 0, 1, 1], [], []>} : vector<4x128xf32>, vector<128x32xf32>, vector<4x32xf32> -> vector<4x32xf32>
    %c0_8 = arith.constant 0 : index
    %c0_9 = arith.constant 0 : index
    %7 = vector.load %arg3[%c0_8, %c0_9] : memref<1x32xf32, #tpu.memory_space<vmem>>, vector<1x32xf32>
    %8 = vector.broadcast %7 : vector<1x32xf32> to vector<4x32xf32>
    %9 = arith.addf %6, %8 : vector<4x32xf32>
    %10 = arith.mulf %9, %9 : vector<4x32xf32>
    %cst_10 = arith.constant dense<0.000000e+00> : vector<4xf32>
    %11 = vector.multi_reduction <add>, %10, %cst_10 [1] : vector<4x32xf32> to vector<4xf32>
    %12 = vector.shape_cast %11 : vector<4xf32> to vector<4x1xf32>
    %cst_11 = arith.constant 1.000000e-24 : f32
    %13 = vector.broadcast %cst_11 : f32 to vector<4x1xf32>
    %14 = arith.maximumf %12, %13 : vector<4x1xf32>
    %15 = math.rsqrt %14 : vector<4x1xf32>
    %16 = vector.broadcast %15 : vector<4x1xf32> to vector<4x32xf32>
    %17 = arith.mulf %9, %16 : vector<4x32xf32>
    %c0_12 = arith.constant 0 : index
    %c0_13 = arith.constant 0 : index
    %c0_14 = arith.constant 0 : index
    %c0_15 = arith.constant 0 : index
    %18 = vector.load %arg1[%c0_12, %c0_13, %c0_14, %c0_15] : memref<2x4x8x128xf32, #tpu.memory_space<vmem>>, vector<2x4x8x128xf32>
    %cst_16 = arith.constant dense<0.000000e+00> : vector<4x8x128xf32>
    %19 = vector.multi_reduction <add>, %18, %cst_16 [0] : vector<2x4x8x128xf32> to vector<4x8x128xf32>
    %cst_17 = arith.constant dense<0.000000e+00> : vector<4x128xf32>
    %20 = vector.multi_reduction <add>, %19, %cst_17 [1] : vector<4x8x128xf32> to vector<4x128xf32>
    %cst_18 = arith.constant 0.0178571437 : f32
    %21 = vector.broadcast %cst_18 : f32 to vector<4x128xf32>
    %22 = arith.mulf %20, %21 : vector<4x128xf32>
    %c0_19 = arith.constant 0 : index
    %c0_20 = arith.constant 0 : index
    %23 = vector.load %arg4[%c0_19, %c0_20] : memref<128x32xf32, #tpu.memory_space<vmem>>, vector<128x32xf32>
    %cst_21 = arith.constant dense<0.000000e+00> : vector<4x32xf32>
    %24 = tpu.matmul %22, %23, %cst_21 {dimension_numbers = #tpu.dot_dimension_numbers<[1], [0], [0], [1], [0, 0, 1, 1], [], []>} : vector<4x128xf32>, vector<128x32xf32>, vector<4x32xf32> -> vector<4x32xf32>
    %c0_22 = arith.constant 0 : index
    %c0_23 = arith.constant 0 : index
    %25 = vector.load %arg5[%c0_22, %c0_23] : memref<1x32xf32, #tpu.memory_space<vmem>>, vector<1x32xf32>
    %26 = vector.broadcast %25 : vector<1x32xf32> to vector<4x32xf32>
    %27 = arith.addf %24, %26 : vector<4x32xf32>
    %28 = arith.mulf %27, %27 : vector<4x32xf32>
    %cst_24 = arith.constant dense<0.000000e+00> : vector<4xf32>
    %29 = vector.multi_reduction <add>, %28, %cst_24 [1] : vector<4x32xf32> to vector<4xf32>
    %30 = vector.shape_cast %29 : vector<4xf32> to vector<4x1xf32>
    %cst_25 = arith.constant 1.000000e-24 : f32
    %31 = vector.broadcast %cst_25 : f32 to vector<4x1xf32>
    %32 = arith.maximumf %30, %31 : vector<4x1xf32>
    %33 = math.rsqrt %32 : vector<4x1xf32>
    %34 = vector.broadcast %33 : vector<4x1xf32> to vector<4x32xf32>
    %35 = arith.mulf %27, %34 : vector<4x32xf32>
    %c0_26 = arith.constant 0 : index
    %c0_27 = arith.constant 0 : index
    %36 = vector.load %arg7[%c0_26, %c0_27] : memref<4x32xf32, #tpu.memory_space<vmem>>, vector<4x32xf32>
    tpu.vector_store %arg7[%c0_26, %c0_27], %17 {strides = array<i32>} : memref<4x32xf32, #tpu.memory_space<vmem>>, vector<4x32xf32>,
    %c0_28 = arith.constant 0 : index
    %c0_29 = arith.constant 0 : index
    %37 = vector.load %arg8[%c0_28, %c0_29] : memref<4x32xf32, #tpu.memory_space<vmem>>, vector<4x32xf32>
    tpu.vector_store %arg8[%c0_28, %c0_29], %35 {strides = array<i32>} : memref<4x32xf32, #tpu.memory_space<vmem>>, vector<4x32xf32>,
    %38 = tpu.transpose %35, [1, 0] : vector<4x32xf32> -> vector<32x4xf32>
    %cst_30 = arith.constant dense<0.000000e+00> : vector<4x4xf32>
    %39 = tpu.matmul %17, %38, %cst_30 {dimension_numbers = #tpu.dot_dimension_numbers<[1], [0], [0], [1], [0, 0, 1, 1], [], []>} : vector<4x32xf32>, vector<32x4xf32>, vector<4x4xf32> -> vector<4x4xf32>
    %cst_31 = arith.constant 14.2857141 : f32
    %40 = vector.broadcast %cst_31 : f32 to vector<4x4xf32>
    %41 = arith.mulf %39, %40 : vector<4x4xf32>
    %42 = arith.mulf %17, %35 : vector<4x32xf32>
    %cst_32 = arith.constant dense<0.000000e+00> : vector<4xf32>
    %43 = vector.multi_reduction <add>, %42, %cst_32 [1] : vector<4x32xf32> to vector<4xf32>
    %44 = vector.shape_cast %43 : vector<4xf32> to vector<4x1xf32>
    %cst_33 = arith.constant 14.2857141 : f32
    %45 = vector.broadcast %cst_33 : f32 to vector<4x1xf32>
    %46 = arith.mulf %44, %45 : vector<4x1xf32>
    %cst_34 = arith.constant dense<0xFF800000> : vector<4xf32>
    %47 = vector.multi_reduction <maximumf>, %41, %cst_34 [1] : vector<4x4xf32> to vector<4xf32>
    %48 = vector.shape_cast %47 : vector<4xf32> to vector<4x1xf32>
    %49 = vector.broadcast %48 : vector<4x1xf32> to vector<4x4xf32>
    %50 = arith.subf %41, %49 : vector<4x4xf32>
    %51 = math.exp %50 : vector<4x4xf32>
    %cst_35 = arith.constant dense<0.000000e+00> : vector<4xf32>
    %52 = vector.multi_reduction <add>, %51, %cst_35 [1] : vector<4x4xf32> to vector<4xf32>
    %53 = vector.shape_cast %52 : vector<4xf32> to vector<4x1xf32>
    %54 = math.log %53 : vector<4x1xf32>
    %55 = arith.addf %48, %54 : vector<4x1xf32>
    %56 = arith.subf %55, %46 : vector<4x1xf32>
    %57 = vector.shape_cast %56 : vector<4x1xf32> to vector<1x4x1xf32>
    %cst_36 = arith.constant dense<0.000000e+00> : vector<1xf32>
    %58 = vector.multi_reduction <add>, %57, %cst_36 [1, 2] : vector<1x4x1xf32> to vector<1xf32>
    %59 = vector.shape_cast %58 : vector<1xf32> to vector<1x1x1xf32>
    %60 = vector.extract %59[0, 0, 0] : f32 from vector<1x1x1xf32>
    %cst_37 = arith.constant 4.000000e+00 : f32
    %61 = arith.divf %60, %cst_37 : f32
    %62 = vector.broadcast %61 : f32 to vector<1x1xf32>
    %c0_38 = arith.constant 0 : index
    %c0_39 = arith.constant 0 : index
    %63 = vector.load %arg6[%c0_38, %c0_39] : memref<1x1xf32, #tpu.memory_space<vmem>>, vector<1x1xf32>
    tpu.vector_store %arg6[%c0_38, %c0_39], %62 {strides = array<i32>} : memref<1x1xf32, #tpu.memory_space<vmem>>, vector<1x1xf32>,
    return
  }
}

</mosaic_0001>

<bundles_post_ra>
// kernel: retrieval_forward.2
= control target key start
LH: loop header
LB: loop body
LE: loop exit
PB: predicated region body
PF: predicated region fallthrough
CT: control target
= control target key end

     0   :  { %s1320_s0 = inlined_call_operand.vmem [shape: f32[4,56,128], index: 0, kind: input, shape index: {}]   ;;  %s1321_s1 = inlined_call_operand.hbm [shape: f32[4,56,128], index: 1, kind: input, shape index: {}]   ;;  %s1322_s2 = inlined_call_operand.vmem [shape: f32[2,4,8,128], index: 2, kind: output, shape index: {0}]   ;;  %s1323_s3 = inlined_call_operand.vmem [shape: f32[2,4,8,128], index: 3, kind: output, shape index: {1}]  }
   0x1   :  { %1324 = sst [smem:[#allocation8_spill]] %s1320_s0 }
   0x2   :  { %9 = vsyncpa [#allocation4], 0 }
   0x3   :  { %11 = vsyncpa [#allocation4 + $0x1], 0  ;;  %s1063_s12 = smov 0   ;;  %s1065_s13 = smov 0  }
   0x4   :  { %s1067_s14 = smov 0   ;;  %s1069_s15 = smov 0  }
   0x5   :  { %s1071_s16 = smov 0   ;;  %s1073_s17 = smov 0  }
   0x6   :  { %s1075_s18 = smov 0   ;;  %s1077_s19 = smov 0  }
   0x7 LB: > { %s26_s20 = sadd.s32 1, %s995_s17  ;;  %s29_s21 = sadd.s32 1, %s999_s18  ;;  %s1003_s19 = sphi %s1077_s19, %s17_s19   ;;  %s999_s18 = sphi %s1075_s18, %s1339_s18   ;;  %s995_s17 = sphi %s1073_s17, %s1338_s17   ;;  %s991_s16 = sphi %s1071_s16, %s1337_s16   ;;  %s987_s15 = sphi %s1069_s15, %s1336_s15   ;;  %s983_s14 = sphi %s1067_s14, %s1335_s14   ;;  %s979_s13 = sphi %s1065_s13, %s1334_s13   ;;  %s975_s12 = sphi %s1063_s12, %s1333_s12  }
   0x8   : > { %p27_p0 = scmp.ge.s32.totalorder %s26_s20, 2  ;;  %s715_s22 = sadd.s32 4294967295, %s1003_s19  }
   0x9   : > { %s717_s23 = sshll.u32 %s999_s18, 1  ;;  %p47_p1 = scmp.ne.s32.totalorder %s983_s14, %s979_s13 }
   0xa   : > { %s1341_s20 = smov (%p27_p0, %s26_s20), 0  ;;  %s1343_s21 = smov (!%p27_p0, %s29_s21), %s999_s18 }
   0xb   : > { %s1109_s24 = sadd.s32 %s995_s17, %s717_s23  ;;  %p31_p2 = scmp.ge.s32.totalorder %s1343_s21, 2 }
   0xc   : > { %p48_p3 = scmp.eq.s32.totalorder %s1003_s19, 0  ;;  %p83_p4 = scmp.ne.s32.totalorder %s979_s13, %s975_s12 }
   0xd   : > { %p84_p5 = scmp.eq.s32.totalorder %s715_s22, 0  ;;  %s1345_s21 = smov (%p31_p2, %s1343_s21), 0 }
   0xe   : > { %p1117_p6 = por %p48_p3, %p47_p1  ;;  %s718_s27 = sshll.u32 %s1345_s21, 1 }
   0xf   : > { %p1121_p7 = por %p84_p5, %p83_p4  ;;  %s36_s28 = sadd.s32 %s718_s27, %s1341_s20 }
  0x10   : > { %s37_s29 = ssub.s32 %s1109_s24, %s36_s28  ;;  %s40_s30 = sadd.s32 1, %s983_s14 }
  0x11   : > { %p38_p8 = scmp.eq.s32.totalorder %s37_s29, 0  ;;  %p722_p9 = scmp.ge.s32.totalorder %s1003_s19, 4 }
  0x13   : > { %s1130_s4 = scalar_select %p38_p8, %s983_s14, %s40_s30  }
  0x14   : > { %155 = sbr.rel (%p722_p9) target bundleno = 107 (0x6b), region = 16 }
  0x1b   : > { %158 = sbr.rel (!%p1117_p6) target bundleno = 83 (0x53), region = 20  ;;  %s160_s5 = sand.u32 (%p1117_p6), 1, %s983_s14  }
  0x1c   : > { %s725_s6 = sshll.u32 (%p1117_p6), %s1109_s24, 1  ;;  %s723_s7 = sshll.u32 (%p1117_p6), %s160_s5, 6 }
  0x1d   : > { %s166_s8 = ssub.s32 (%p1117_p6), 7, %s725_s6  ;;  %s762_s9 = sshll.u32 (%p1117_p6), %s1109_s24, 4 }
  0x1e   : > { %p167_p10 = scmp.lt.s32.totalorder (%p1117_p6), %s166_s8, 2  ;;  %s1327_s0 = sld [smem:[#allocation8_spill]] (%p1117_p6) }
  0x1f   : > { %s1146_s23 = scalar_lea.vmem (%p1117_p6), [#allocation2], %s723_s7  }
  0x22   : > { %s1347_s8 = smov (!%p167_p10, %s166_s8), 2 }
  0x23   : > { %s726_s22 = sshll.u32 %s1347_s8, 9 }
  0x24   : > { %s1143_s12 = scalar_lea.vmem %s1327_s0, %s762_s9   ;;  %p729_p11 = scmp.eq.s32.totalorder %s726_s22, 0 }
  0x25   : > { %s1149_s27 = sshrl.u32 (!%p729_p11), %s1347_s8, 1 }
  0x26   : > { %175 = sbr.rel (%p729_p11) target bundleno = 83 (0x53), region = 24  ;;  %p730_p12 = scmp.le.s32.totalorder (!%p729_p11), %s1149_s27, 0 }
  0x2d   : > { %642 = sbr.rel (%p730_p12) target bundleno = 62 (0x3e), region = 151  ;;  %s1328_s28 = smov (!%p730_p12), %s1146_s23 }
  0x2e   : > { %s1329_s29 = smov (!%p730_p12), %s1143_s12  ;;  %s1158_s30 = smov (!%p730_p12), 0  }
  0x2f   : > { %s1160_s5 = smov (!%p730_p12), 0  }
  0x34 LB: >> { %v257_v0 = vld [vmem:[%s1011_s29] sm:$0xff]  ;;  %v259_v1 = vld [vmem:[%s1011_s29 + $0x8] sm:$0xff]  ;;  %v261_v2 = vld [vmem:[%s1011_s29 + $0x38] sm:$0xff]  ;;  %s273_s6 = sadd.s32 1, %s1015_s30  ;;  %s251_s5 = sadd.s32 1, %s1019_s5   ;;  %s1019_s5 = sphi %s1160_s5, %s251_s5   ;;  %s1015_s30 = sphi %s1158_s30, %s1330_s30   ;;  %s1011_s29 = sphi %s1329_s29, %s278_s29   ;;  %s1007_s28 = sphi %s1328_s28, %s279_s28  }
  0x35   : >> { %258 = vst [vmem:[%s1007_s28] sm:$0xff] %v257_v0  ;;  %260 = vst [vmem:[%s1007_s28 + $0x8] sm:$0xff] %v259_v1  ;;  %v263_v3 = vld [vmem:[%s1011_s29 + $0x40] sm:$0xff]  ;;  %v265_v4 = vld [vmem:[%s1011_s29 + $0x70] sm:$0xff]  ;;  %p274_p13 = scmp.ge.s32.totalorder %s273_s6, %s1149_s27  ;;  %p250_p0 = scmp.ge.s32.totalorder %s251_s5, %s1149_s27 }
  0x36   : >> { %262 = vst [vmem:[%s1007_s28 + $0x10] sm:$0xff] %v261_v2  ;;  %v267_v5 = vld [vmem:[%s1011_s29 + $0x78] sm:$0xff]  ;;  %264 = vst [vmem:[%s1007_s28 + $0x18] sm:$0xff] %v263_v3  ;;  %v269_v6 = vld [vmem:[%s1011_s29 + $0xa8] sm:$0xff] }
  0x37   : >> { %266 = vst [vmem:[%s1007_s28 + $0x20] sm:$0xff] %v265_v4  ;;  %268 = vst [vmem:[%s1007_s28 + $0x28] sm:$0xff] %v267_v5  ;;  %v271_v7 = vld [vmem:[%s1011_s29 + $0xb0] sm:$0xff]  ;;  %s1349_s6 = smov (%p274_p13, %s273_s6), 0  ;;  %253 = sbr.rel (!%p250_p0) target bundleno = 52 (0x34), region = 157 }
  0x38   : >> { %270 = vst [vmem:[%s1007_s28 + $0x30] sm:$0xff] %v269_v6  ;;  %272 = vst [vmem:[%s1007_s28 + $0x38] sm:$0xff] %v271_v7  ;;  %s731_s7 = sshll.u32 %s1349_s6, 4  ;;  %s1330_s30 = smov %s1349_s6 }
  0x39   : >> { %s278_s29 = scalar_lea.vmem %s1143_s12, %s731_s7   ;;  %s279_s28 = scalar_lea.vmem %s1146_s23, %s731_s7 [#allocation2]  }
  0x3e PF: > { %s1179_s9 = sand.u32 1, %s1347_s8   ;;  %s763_s10 = sshll.u32 %s1149_s27, 4 }
  0x3f   : > { %s1183_s11 = scalar_lea.vmem %s1143_s12, %s763_s10   ;;  %s1186_s22 = scalar_lea.vmem %s1146_s23, %s763_s10 [#allocation2]  }
  0x40   : > { %p736_p1 = scmp.le.s32.totalorder %s1179_s9, 0 }
  0x41   : > { %s1331_s5 = smov (!%p736_p1), %s1186_s22  ;;  %s1332_s28 = smov (!%p736_p1), %s1183_s11 }
  0x42   : > { %656 = sbr.rel (%p736_p1) target bundleno = 83 (0x53), region = 162  ;;  %s1029_s29 = smov (!%p736_p1), 0  }
  0x43   : > { %s1033_s30 = smov (!%p736_p1), 0  }
  0x49 LB: >> { %v296_v8 = vld [vmem:[%s1027_s28] sm:$0xff]  ;;  %v298_v9 = vld [vmem:[%s1027_s28 + $0x38] sm:$0xff]  ;;  %v300_v10 = vld [vmem:[%s1027_s28 + $0x70] sm:$0xff]  ;;  %s304_s8 = sadd.s32 1, %s1031_s29  ;;  %s290_s30 = sadd.s32 1, %s1035_s30   ;;  %s1035_s30 = sphi %s1033_s30, %s290_s30   ;;  %s1031_s29 = sphi %s1029_s29, %s1030_s29   ;;  %s1027_s28 = sphi %s1332_s28, %s309_s28   ;;  %s1023_s5 = sphi %s1331_s5, %s310_s5  }
  0x4a   : >> { %297 = vst [vmem:[%s1023_s5] sm:$0xff] %v296_v8  ;;  %299 = vst [vmem:[%s1023_s5 + $0x10] sm:$0xff] %v298_v9  ;;  %v302_v11 = vld [vmem:[%s1027_s28 + $0xa8] sm:$0xff]  ;;  %p305_p2 = scmp.ge.s32.totalorder %s304_s8, %s1179_s9  ;;  %p289_p3 = scmp.ge.s32.totalorder %s290_s30, %s1179_s9 }
  0x4b   : >> { %301 = vst [vmem:[%s1023_s5 + $0x20] sm:$0xff] %v300_v10  ;;  %303 = vst [vmem:[%s1023_s5 + $0x30] sm:$0xff] %v302_v11 }
  0x4c   : >> { %s1351_s8 = smov (%p305_p2, %s304_s8), 0  ;;  %292 = sbr.rel (!%p289_p3) target bundleno = 73 (0x49), region = 168 }
  0x4d   : >> { %s737_s12 = sshll.u32 %s1351_s8, 3  ;;  %s1030_s29 = smov %s1351_s8  }
  0x4e   : >> { %s309_s28 = scalar_lea.vmem %s1183_s11, %s737_s12   ;;  %s310_s5 = scalar_lea.vmem %s1186_s22, %s737_s12 [#allocation2]  }
  0x53 PF: > { %316 = sbr.rel (!%p1117_p6) target bundleno = 107 (0x6b), region = 72 }
  0x5a   : > { %s317_s23 = sand.u32 1, %s983_s14   ;;  %s741_s27 = sshll.u32 %s1109_s24, 1 }
  0x5b   : > { %s739_s6 = sshll.u32 %s317_s23, 6  ;;  %s325_s7 = ssub.s32 7, %s741_s27 }
  0x5c   : > { %p326_p4 = scmp.lt.s32.totalorder %s325_s7, 2  ;;  %s318_s28 = scalar_lea.sflag [#allocation4], %s317_s23 }
  0x5d   : > { %s321_s8 = scalar_lea.vmem [#allocation3], %s739_s6 }
  0x5e   : > { %s1353_s7 = smov (!%p326_p4, %s325_s7), 2 }
  0x5f   : > { %s742_s10 = sshll.u32 %s1353_s7, 9 }
  0x60   : > { %s330_s29 = ssub.s32 1024, %s742_s10 }
  0x61   : > { %331 = vsyncadd %s318_s28, %s330_s29  ;;  %p743_p5 = scmp.ne.s32.totalorder %s742_s10, 0  ;;  %s765_s9 = sshll.u32 %s1109_s24, 8 }
  0x62   : > { %s334_s25 = scalar_lea.hbm %s1321_s1, %s765_s9  ;;  %s341_s5 = sld [smem:[#allocation0]]  }
  0x63   : > { %s349_s30 = sshll.u32 %s321_s8, 4  ;;  %s1037_s12 = smov 896   ;;  %s350_s30 = int_to_ptr.vmem [resolvable:$true] %s349_s30 }
  0x64   : > { %356 = sst [smem:[#allocation6]] %s1037_s12  ;;  %s1038_s27 = smov 256  }
  0x65   : > { %360 = sst [smem:[#allocation6 + $0x2]] %s1353_s7  ;;  %s1039_s0 = smov 128  }
  0x66   : > { %358 = sst [smem:[#allocation6 + $0x1]] %s1038_s27  ;;  %s1040_s29 = smov 8  }
  0x67   : > { %362 = sst [smem:[#allocation6 + $0x3]] %s1039_s0  ;;  %s1041_s24 = smov [#allocation5]  }
  0x68   : > { %s747_s23 = sshll.u32 %s341_s5, 26  ;;  %364 = sst [smem:[#allocation6 + $0x4]] %s1039_s0 }
  0x69   : > { %s748_s6 = sadd.s32 134217728, %s747_s23  ;;  %366 = sst [smem:[#allocation6 + $0x5]] %s1040_s29 }
  0x6a   : > { %368 = dma.general (%p743_p5), %s334_s25, %s742_s10, %s350_s30, %s318_s28, %s1041_s24, [#allocation6], %s748_s6, 0  }
  0x6b PF: > { %p750_p6 = scmp.ge.s32.totalorder %s1003_s19, 1  ;;  %p370_p8 = scmp.lt.s32.totalorder %s1003_s19, 5 }
  0x6d   : > { %p371_p9 = pnand %p750_p6, %p370_p8 }
  0x6e   : > { %s377_s7 = sand.u32 (!%p371_p9), 1, %s979_s13  }
  0x6f   : > { %374 = sbr.rel (%p371_p9) target bundleno = 148 (0x94), region = 76  ;;  %s751_s8 = sshll.u32 (!%p371_p9), %s377_s7, 6 }
  0x70   : > { %s1217_s9 = scalar_lea.vmem (!%p371_p9), [#allocation2], %s751_s8  ;;  %s384_s0 = scalar_lea.sflag (!%p371_p9), [#allocation4], %s377_s7 }
  0x71   : > { %s1219_s11 = scalar_lea.vmem (!%p371_p9), [#allocation3], %s751_s8 }
  0x76   : > { %970 = dma.done.wait (%p1121_p7), %s384_s0, 1024  }
  0x77   : > { %972 = vsyncadd (%p1121_p7), %s384_s0, 4294966272  ;;  %p433_p10 = scmp.lt.s32.totalorder %s991_s16, 1  ;;  %p757_p11 = scmp.ne.s32.totalorder %s987_s15, 0 }
  0x78   : > { %v1042_v12 = vmov (!%p757_p11), 0.0  }
  0x79   : > { %s434_s10 = scalar_select %p433_p10, %s991_s16, 1 }
  0x7a   : > { %446 = sbr.rel (%p757_p11) target bundleno = 129 (0x81), region = 88 }
  0x7b   : > { %s768_s28 = sshll.u32 %s434_s10, 5 }
  0x7c   : > { %s1230_s5 = scalar_lea.vmem %s1322_s2, %s768_s28  ;;  %s1235_s27 = scalar_lea.vmem %s1323_s3, %s768_s28 }
  0x7d   : > { %447 = vst [vmem:[%s1230_s5] sm:$0xff] (!%p757_p11), %v1042_v12  ;;  %448 = vst [vmem:[%s1230_s5 + $0x8] sm:$0xff] (!%p757_p11), %v1042_v12 }
  0x7e   : > { %449 = vst [vmem:[%s1230_s5 + $0x10] sm:$0xff] (!%p757_p11), %v1042_v12  ;;  %450 = vst [vmem:[%s1230_s5 + $0x18] sm:$0xff] (!%p757_p11), %v1042_v12 }
  0x7f   : > { %451 = vst [vmem:[%s1235_s27] sm:$0xff] (!%p757_p11), %v1042_v12  ;;  %452 = vst [vmem:[%s1235_s27 + $0x8] sm:$0xff] (!%p757_p11), %v1042_v12 }
  0x80   : > { %453 = vst [vmem:[%s1235_s27 + $0x10] sm:$0xff] (!%p757_p11), %v1042_v12  ;;  %454 = vst [vmem:[%s1235_s27 + $0x18] sm:$0xff] (!%p757_p11), %v1042_v12 }
  0x81 PF: > { %s758_s26 = sshll.u32 %s991_s16, 1  ;;  %v458_v13 = vlaneseq  ;;  %v470_v16 = vld [vmem:[%s1217_s9] sm:$0xff]  ;;  %v471_v19 = vld [vmem:[%s1217_s9 + $0x8] sm:$0xff]  ;;  %v472_v20 = vld [vmem:[%s1217_s9 + $0x10] sm:$0xff] }
  0x82   : > { %s456_s23 = sadd.s32 %s987_s15, %s758_s26  ;;  %v474_v21 = vld [vmem:[%s1217_s9 + $0x20] sm:$0xff]  ;;  %v476_v22 = vld [vmem:[%s1217_s9 + $0x30] sm:$0xff]  ;;  %v473_v23 = vld [vmem:[%s1217_s9 + $0x18] sm:$0xff] }
  0x83   : > { %s759_s6 = sshll.u32 %s456_s23, 4  ;;  %v459_v14 = vshrl.u32 %v458_v13, 7  ;;  %v506_v24 = vld [vmem:[%s1219_s11] sm:$0xff]  ;;  %v508_v25 = vld [vmem:[%s1219_s11 + $0x10] sm:$0xff]  ;;  %v475_v27 = vld [vmem:[%s1217_s9 + $0x28] sm:$0xff] }
  0x84   : > { %v461_v15 = vstv %s759_s6  ;;  %v477_v28 = vld [vmem:[%s1217_s9 + $0x38] sm:$0xff]  ;;  %v510_v29 = vld [vmem:[%s1219_s11 + $0x20] sm:$0xff]  ;;  %v467_v32 = vld [vmem:[%s1230_s5 + $0x8] sm:$0xff] }
  0x85   : > { %v460_v17 = vadd.s32 8, %v459_v14  ;;  %v462_v18 = vadd.s32 %v461_v15, %v459_v14  ;;  %v466_v30 = vld [vmem:[%s1230_s5] sm:$0xff]  ;;  %v507_v36 = vld [vmem:[%s1219_s11 + $0x8] sm:$0xff]  ;;  %v509_v37 = vld [vmem:[%s1219_s11 + $0x18] sm:$0xff] }
  0x86   : > { %v511_v40 = vld [vmem:[%s1219_s11 + $0x28] sm:$0xff]  ;;  %v512_v42 = vld [vmem:[%s1219_s11 + $0x30] sm:$0xff]  ;;  %v469_v47 = vld [vmem:[%s1230_s5 + $0x18] sm:$0xff] }
  0x87   : > { %v463_v26 = vadd.s32 %v461_v15, %v460_v17  ;;  %vm464_vm0 = vcmp.lt.s32.totalorder %v462_v18, 56  ;;  %v468_v45 = vld [vmem:[%s1230_s5 + $0x10] sm:$0xff]  ;;  %v513_v53 = vld [vmem:[%s1219_s11 + $0x38] sm:$0xff]  ;;  %v502_v62 = vld [vmem:[%s1235_s27] sm:$0xff] }
  0x88   : > { %v482_v31 = vsel %vm464_vm0, %v470_v16, 0.0  ;;  %v484_v33 = vsel %vm464_vm0, %v472_v20, 0.0  ;;  %v486_v34 = vsel %vm464_vm0, %v474_v21, 0.0  ;;  %v488_v35 = vsel %vm464_vm0, %v476_v22, 0.0  ;;  %v503_v63 = vld [vmem:[%s1235_s27 + $0x8] sm:$0xff]  ;;  %v504_v0 = vld [vmem:[%s1235_s27 + $0x10] sm:$0xff] }
  0x89   : > { %vm465_vm1 = vcmp.lt.s32.totalorder %v463_v26, 56  ;;  %v514_v38 = vsel %vm464_vm0, %v506_v24, 0.0  ;;  %v516_v39 = vsel %vm464_vm0, %v508_v25, 0.0  ;;  %v518_v41 = vsel %vm464_vm0, %v510_v29, 0.0  ;;  %v505_v4 = vld [vmem:[%s1235_s27 + $0x18] sm:$0xff] }
  0x8a   : > { %v483_v43 = vsel %vm465_vm1, %v471_v19, 0.0  ;;  %v485_v44 = vsel %vm465_vm1, %v473_v23, 0.0  ;;  %v487_v46 = vsel %vm465_vm1, %v475_v27, 0.0  ;;  %v489_v48 = vsel %vm465_vm1, %v477_v28, 0.0 }
  0x8b   : > { %v490_v49 = vadd.f32 %v483_v43, %v482_v31  ;;  %v491_v50 = vadd.f32 %v485_v44, %v484_v33  ;;  %v492_v51 = vadd.f32 %v487_v46, %v486_v34  ;;  %v493_v52 = vadd.f32 %v489_v48, %v488_v35 }
  0x8c   : > { %v515_v54 = vsel %vm465_vm1, %v507_v36, 0.0  ;;  %v517_v55 = vsel %vm465_vm1, %v509_v37, 0.0  ;;  %v519_v56 = vsel %vm465_vm1, %v511_v40, 0.0  ;;  %v520_v57 = vsel %vm464_vm0, %v512_v42, 0.0 }
  0x8d   : > { %v494_v58 = vadd.f32 %v490_v49, %v466_v30  ;;  %v495_v59 = vadd.f32 %v491_v50, %v467_v32  ;;  %v496_v60 = vadd.f32 %v492_v51, %v468_v45  ;;  %v497_v61 = vadd.f32 %v493_v52, %v469_v47 }
  0x8e   : > { %v522_v1 = vadd.f32 %v515_v54, %v514_v38  ;;  %v523_v2 = vadd.f32 %v517_v55, %v516_v39  ;;  %v524_v3 = vadd.f32 %v519_v56, %v518_v41  ;;  %v521_v5 = vsel %vm465_vm1, %v513_v53, 0.0 }
  0x8f   : > { %498 = vst [vmem:[%s1230_s5] sm:$0xff] %v494_v58  ;;  %499 = vst [vmem:[%s1230_s5 + $0x8] sm:$0xff] %v495_v59  ;;  %v525_v6 = vadd.f32 %v521_v5, %v520_v57 }
  0x90   : > { %500 = vst [vmem:[%s1230_s5 + $0x10] sm:$0xff] %v496_v60  ;;  %501 = vst [vmem:[%s1230_s5 + $0x18] sm:$0xff] %v497_v61  ;;  %v526_v7 = vadd.f32 %v522_v1, %v502_v62  ;;  %v527_v8 = vadd.f32 %v523_v2, %v503_v63  ;;  %v528_v9 = vadd.f32 %v524_v3, %v504_v0 }
  0x91   : > { %v529_v10 = vadd.f32 %v525_v6, %v505_v4 }
  0x92   : > { %530 = vst [vmem:[%s1235_s27] sm:$0xff] %v526_v7  ;;  %531 = vst [vmem:[%s1235_s27 + $0x8] sm:$0xff] %v527_v8 }
  0x93   : > { %532 = vst [vmem:[%s1235_s27 + $0x10] sm:$0xff] %v528_v9  ;;  %533 = vst [vmem:[%s1235_s27 + $0x18] sm:$0xff] %v529_v10 }
  0x94 PF: > { %s17_s19 = sadd.s32 1, %s1003_s19   ;;  %s1333_s12 = smov %s979_s13 }
  0x95   : > { %p14_p7 = scmp.ge.s32.totalorder %s17_s19, 6   ;;  %s1334_s13 = smov %s983_s14 }
  0x96   : > { %s1335_s14 = smov %s1130_s4  ;;  %s1336_s15 = smov %s995_s17 }
  0x97   : > { %s1337_s16 = smov %s999_s18  ;;  %s1338_s17 = smov %s1341_s20 }
  0x98   : > { %s1339_s18 = smov %s1345_s21  ;;  %16 = sbr.rel (!%p14_p7) target bundleno = 7 (0x7), region = 179 }
  0x9f   :  { %571 = vsyncpa [#allocation4], 1 }
  0xa0   :  { %573 = vsyncpa [#allocation4 + $0x1], 1 }

// kernel: retrieval_forward.3
= control target key start
LH: loop header
LB: loop body
LE: loop exit
PB: predicated region body
PF: predicated region fallthrough
CT: control target
= control target key end

     0   :  { %14 = vsyncpa [#allocation3], 0  ;;  %v734_v3 = vmov 0.0|0.0   ;;  %vm735_vm0 = vmmov 0   ;;  %v736_v11 = vmov 0.0   ;;  %s1074_s0 = inlined_call_operand.vmem [shape: f32[2,4,8,128], index: 0, kind: input, shape index: {}]   ;;  %s1075_s1 = inlined_call_operand.vmem [shape: f32[2,4,8,128], index: 1, kind: input, shape index: {}]   ;;  %s1076_s2 = inlined_call_operand.vmem [shape: f32[128,32], index: 2, kind: input, shape index: {}]   ;;  %s1077_s3 = inlined_call_operand.vmem [shape: f32[1,32], index: 3, kind: input, shape index: {}]   ;;  %s1078_s4 = inlined_call_operand.vmem [shape: f32[128,32], index: 4, kind: input, shape index: {}]   ;;  %s1079_s5 = inlined_call_operand.vmem [shape: f32[1,32], index: 5, kind: input, shape index: {}]   ;;  %s1080_s6 = inlined_call_operand.hbm [shape: f32[1,1], index: 6, kind: output, shape index: {0}]   ;;  %s1081_s7 = inlined_call_operand.hbm [shape: f32[4,32], index: 7, kind: output, shape index: {1}]   ;;  %s1082_s8 = inlined_call_operand.hbm [shape: f32[4,32], index: 8, kind: output, shape index: {2}]  }
   0x1   :  { %v220_v0 = vld [vmem:[%s1078_s4] sm:$0xff]  ;;  %v221_v1 = vld [vmem:[%s1078_s4 + $0x8] sm:$0xff]  ;;  %624 = vmatprep.subr.bf16.mxu1 %v734_v3  ;;  %600 = vmatprep.subr.bf16.mxu0 %v734_v3  ;;  %v222_v6 = vld [vmem:[%s1078_s4 + $0x10] sm:$0xff] }
   0x2   :  { %v68_v2 = vld [vmem:[%s1076_s2] sm:$0xff]  ;;  %v625_v4 = vpack.c.bf16 %v221_v1, %v220_v0  ;;  %v69_v5 = vld [vmem:[%s1076_s2 + $0x8] sm:$0xff]  ;;  %v223_v7 = vld [vmem:[%s1078_s4 + $0x18] sm:$0xff]  ;;  %592 = vmatprep.mubr.msk.f32.mxu1 %vm735_vm0, %v736_v11  ;;  %557 = vmatprep.mubr.msk.f32.mxu0 %vm735_vm0, %v736_v11 }
   0x3   :  { %v601_v8 = vpack.c.bf16 %v69_v5, %v68_v2  ;;  %v70_v9 = vld [vmem:[%s1076_s2 + $0x10] sm:$0xff]  ;;  %v71_v10 = vld [vmem:[%s1076_s2 + $0x18] sm:$0xff]  ;;  %v628_v12 = vpack.c.bf16 %v223_v7, %v222_v6  ;;  %v224_v14 = vld [vmem:[%s1078_s4 + $0x20] sm:$0xff] }
   0x4   :  { %626 = vmatpush3.bf16.msra.mxu1 %v625_v4  ;;  %v604_v13 = vpack.c.bf16 %v71_v10, %v70_v9  ;;  %v225_v15 = vld [vmem:[%s1078_s4 + $0x28] sm:$0xff]  ;;  %v72_v16 = vld [vmem:[%s1076_s2 + $0x20] sm:$0xff]  ;;  %v226_v18 = vld [vmem:[%s1078_s4 + $0x30] sm:$0xff] }
   0x5   :  { %602 = vmatpush3.bf16.msra.mxu0 %v601_v8  ;;  %627 = vmatprep.subr.bf16.mxu1 %v734_v3  ;;  %v73_v17 = vld [vmem:[%s1076_s2 + $0x28] sm:$0xff]  ;;  %v227_v19 = vld [vmem:[%s1078_s4 + $0x38] sm:$0xff]  ;;  %v838_v20 = vld [vmem:[%s1076_s2 + $0x30] sm:$0xff]  ;;  %v631_v24 = vpack.c.bf16 %v225_v15, %v224_v14 }
   0x6   :  { %603 = vmatprep.subr.bf16.mxu0 %v734_v3  ;;  %v75_v21 = vld [vmem:[%s1076_s2 + $0x38] sm:$0xff]  ;;  %v846_v22 = vld [vmem:[%s1078_s4 + $0x40] sm:$0xff]  ;;  %v851_v23 = vld [vmem:[%s1078_s4 + $0x48] sm:$0xff]  ;;  %v607_v30 = vpack.c.bf16 %v73_v17, %v72_v16  ;;  %v634_v41 = vpack.c.bf16 %v227_v19, %v226_v18 }
   0x7   :  { %v856_v25 = vld [vmem:[%s1076_s2 + $0x40] sm:$0xff]  ;;  %v861_v26 = vld [vmem:[%s1076_s2 + $0x48] sm:$0xff]  ;;  %v866_v27 = vld [vmem:[%s1078_s4 + $0x50] sm:$0xff]  ;;  %v610_v42 = vpack.c.bf16 %v75_v21, %v838_v20  ;;  %v637_v43 = vpack.c.bf16 %v851_v23, %v846_v22 }
   0x8   :  { %629 = vmatpush3.bf16.msra.mxu1 %v628_v12  ;;  %v871_v28 = vld [vmem:[%s1078_s4 + $0x58] sm:$0xff]  ;;  %v876_v29 = vld [vmem:[%s1076_s2 + $0x50] sm:$0xff]  ;;  %v887_v32 = vld [vmem:[%s1078_s4 + $0x60] sm:$0xff]  ;;  %v613_v47 = vpack.c.bf16 %v861_v26, %v856_v25 }
   0x9   :  { %605 = vmatpush3.bf16.msra.mxu0 %v604_v13  ;;  %630 = vmatprep.subr.bf16.mxu1 %v734_v3  ;;  %v882_v31 = vld [vmem:[%s1076_s2 + $0x58] sm:$0xff]  ;;  %v892_v33 = vld [vmem:[%s1078_s4 + $0x68] sm:$0xff]  ;;  %v898_v34 = vld [vmem:[%s1076_s2 + $0x60] sm:$0xff]  ;;  %v640_v48 = vpack.c.bf16 %v871_v28, %v866_v27 }
   0xa   :  { %606 = vmatprep.subr.bf16.mxu0 %v734_v3  ;;  %v903_v35 = vld [vmem:[%s1076_s2 + $0x68] sm:$0xff]  ;;  %v908_v36 = vld [vmem:[%s1078_s4 + $0x70] sm:$0xff]  ;;  %v913_v37 = vld [vmem:[%s1078_s4 + $0x78] sm:$0xff]  ;;  %v616_v49 = vpack.c.bf16 %v882_v31, %v876_v29  ;;  %v643_v53 = vpack.c.bf16 %v892_v33, %v887_v32 }
   0xb   :  { %v918_v38 = vld [vmem:[%s1076_s2 + $0x70] sm:$0xff]  ;;  %v923_v39 = vld [vmem:[%s1076_s2 + $0x78] sm:$0xff]  ;;  %v180_v40 = vld [vmem:[%s1075_s1] sm:$0xff]  ;;  %v619_v60 = vpack.c.bf16 %v903_v35, %v898_v34  ;;  %v646_v61 = vpack.c.bf16 %v913_v37, %v908_v36 }
   0xc   :  { %632 = vmatpush3.bf16.msra.mxu1 %v631_v24  ;;  %v181_v44 = vld [vmem:[%s1075_s1 + $0x8] sm:$0xff]  ;;  %v182_v45 = vld [vmem:[%s1075_s1 + $0x10] sm:$0xff]  ;;  %v183_v46 = vld [vmem:[%s1075_s1 + $0x18] sm:$0xff]  ;;  %v622_v62 = vpack.c.bf16 %v923_v39, %v918_v38 }
   0xd   :  { %608 = vmatpush3.bf16.msra.mxu0 %v607_v30  ;;  %633 = vmatprep.subr.bf16.mxu1 %v734_v3  ;;  %v184_v50 = vld [vmem:[%s1075_s1 + $0x20] sm:$0xff]  ;;  %v185_v51 = vld [vmem:[%s1075_s1 + $0x28] sm:$0xff]  ;;  %v186_v52 = vld [vmem:[%s1075_s1 + $0x30] sm:$0xff] }
   0xe   :  { %609 = vmatprep.subr.bf16.mxu0 %v734_v3  ;;  %v187_v54 = vld [vmem:[%s1075_s1 + $0x38] sm:$0xff]  ;;  %v188_v55 = vadd.f32 %v184_v50, %v180_v40  ;;  %v189_v56 = vadd.f32 %v185_v51, %v181_v44  ;;  %v190_v57 = vadd.f32 %v186_v52, %v182_v45  ;;  %v28_v58 = vld [vmem:[%s1074_s0] sm:$0xff]  ;;  %v29_v59 = vld [vmem:[%s1074_s0 + $0x8] sm:$0xff] }
   0xf   :  { %v191_v63 = vadd.f32 %v187_v54, %v183_v46  ;;  %v30_v0 = vld [vmem:[%s1074_s0 + $0x10] sm:$0xff]  ;;  %v31_v1 = vld [vmem:[%s1074_s0 + $0x18] sm:$0xff]  ;;  %v32_v2 = vld [vmem:[%s1074_s0 + $0x20] sm:$0xff] }
  0x10   :  { %635 = vmatpush3.bf16.msra.mxu1 %v634_v41  ;;  %v192_v4 = vrot.slane %v188_v55, 4  ;;  %v198_v5 = vrot.slane %v189_v56, 4  ;;  %v204_v6 = vrot.slane %v190_v57, 4  ;;  %v33_v7 = vld [vmem:[%s1074_s0 + $0x28] sm:$0xff]  ;;  %v34_v8 = vld [vmem:[%s1074_s0 + $0x30] sm:$0xff]  ;;  %v35_v9 = vld [vmem:[%s1074_s0 + $0x38] sm:$0xff]  ;;  %v36_v10 = vadd.f32 %v32_v2, %v28_v58 }
  0x11   :  { %611 = vmatpush3.bf16.msra.mxu0 %v610_v42  ;;  %636 = vmatprep.subr.bf16.mxu1 %v734_v3  ;;  %v210_v12 = vrot.slane %v191_v63, 4  ;;  %v37_v13 = vadd.f32 %v33_v7, %v29_v59  ;;  %v38_v14 = vadd.f32 %v34_v8, %v30_v0  ;;  %v39_v15 = vadd.f32 %v35_v9, %v31_v1 }
  0x12   :  { %15 = vsyncpa [#allocation5], 0  ;;  %612 = vmatprep.subr.bf16.mxu0 %v734_v3  ;;  %v193_v16 = vadd.f32 %v192_v4, %v188_v55  ;;  %v199_v17 = vadd.f32 %v198_v5, %v189_v56  ;;  %v205_v18 = vadd.f32 %v204_v6, %v190_v57  ;;  %v40_v19 = vrot.slane %v36_v10, 4  ;;  %v486_v36 = vld [vmem:[%s1079_s5] ss:$0 sm:$0xff] }
  0x13   :  { %vm95_vm1 = vcmask 1041409   ;;  %v211_v20 = vadd.f32 %v210_v12, %v191_v63  ;;  %v46_v21 = vrot.slane %v37_v13, 4  ;;  %v52_v22 = vrot.slane %v38_v14, 4  ;;  %v485_v37 = vld [vmem:[%s1077_s3] ss:$0 sm:$0xff]  ;;  %s737_s3 = smov [#allocation4]  }
  0x14   :  { %v58_v23 = vrot.slane %v39_v15, 4  ;;  %638 = vmatpush3.bf16.msra.mxu1 %v637_v43  ;;  %vm97_vm2 = vcmask 1042434   ;;  %v194_v24 = vrot.slane %v193_v16, 2  ;;  %v200_v25 = vrot.slane %v199_v17, 2  ;;  %s460_s5 = sshll.u32 %s737_s3, 4  ;;  %s461_s5 = int_to_ptr.vmem [resolvable:$true] %s460_s5 }
  0x15   :  { %v206_v26 = vrot.slane %v205_v18, 2  ;;  %v41_v30 = vadd.f32 %v40_v19, %v36_v10  ;;  %614 = vmatpush3.bf16.msra.mxu0 %v613_v47  ;;  %639 = vmatprep.subr.bf16.mxu1 %v734_v3  ;;  %vm99_vm3 = vcmask 1043459   ;;  %v212_v40 = vrot.slane %v211_v20, 2  ;;  %s664_s11 = scalar_lea.vmem %s461_s5, 64  ;;  %p669_p1 = scmp.lt.s32.totalorder %s461_s5, %s461_s5 }
  0x16   :  { %v47_v41 = vadd.f32 %v46_v21, %v37_v13  ;;  %v53_v42 = vadd.f32 %v52_v22, %v38_v14  ;;  %v59_v44 = vadd.f32 %v58_v23, %v39_v15  ;;  %615 = vmatprep.subr.bf16.mxu0 %v734_v3  ;;  %v195_v45 = vadd.f32 %v194_v24, %v193_v16  ;;  %p665_p0 = scmp.ne.s32.totalorder %s461_s5, %s664_s11  ;;  %p670_p2 = scmp.lt.s32.totalorder %s664_s11, %s664_s11 }
  0x17   :  { %v201_v46 = vadd.f32 %v200_v25, %v199_v17  ;;  %v207_v50 = vadd.f32 %v206_v26, %v205_v18  ;;  %v42_v51 = vrot.slane %v41_v30, 2  ;;  %v213_v43 = vadd.f32 %v212_v40, %v211_v20 }
  0x18   :  { %v48_v52 = vrot.slane %v47_v41, 2  ;;  %v54_v54 = vrot.slane %v53_v42, 2  ;;  %v60_v55 = vrot.slane %v59_v44, 2  ;;  %641 = vmatpush3.bf16.msra.mxu1 %v640_v48  ;;  %v196_v47 = vrot.slane %v195_v45, 1  ;;  %p671_p3 = por %p670_p2, %p669_p1 }
  0x19   :  { %v202_v56 = vrot.slane %v201_v46, 1  ;;  %v208_v57 = vrot.slane %v207_v50, 1  ;;  %v43_v58 = vadd.f32 %v42_v51, %v41_v30  ;;  %617 = vmatpush3.bf16.msra.mxu0 %v616_v49  ;;  %642 = vmatprep.subr.bf16.mxu1 %v734_v3  ;;  %v214_v59 = vrot.slane %v213_v43, 1 }
  0x1a   :  { %v49_v63 = vadd.f32 %v48_v52, %v47_v41  ;;  %v55_v0 = vadd.f32 %v54_v54, %v53_v42  ;;  %v61_v1 = vadd.f32 %v60_v55, %v59_v44  ;;  %618 = vmatprep.subr.bf16.mxu0 %v734_v3  ;;  %v197_v2 = vadd.f32 %v196_v47, %v195_v45  ;;  %p672_p4 = pnand %p671_p3, %p665_p0 }
  0x1b   :  { %v203_v4 = vadd.f32 %v202_v56, %v201_v46  ;;  %v209_v27 = vadd.f32 %v208_v57, %v207_v50  ;;  %v44_v28 = vrot.slane %v43_v58, 1  ;;  %v215_v48 = vadd.f32 %v214_v59, %v213_v43 }
  0x1c   :  { %v50_v5 = vrot.slane %v49_v63, 1  ;;  %v56_v6 = vrot.slane %v55_v0, 1  ;;  %v62_v7 = vrot.slane %v61_v1, 1  ;;  %644 = vmatpush3.bf16.msra.mxu1 %v643_v53  ;;  %v216_v29 = vmul.f32 0.017857144, %v197_v2 }
  0x1d   :  { %v217_v31 = vmul.f32 0.017857144, %v203_v4  ;;  %v218_v49 = vmul.f32 0.017857144, %v209_v27  ;;  %v45_v8 = vadd.f32 %v44_v28, %v43_v58  ;;  %620 = vmatpush3.bf16.msra.mxu0 %v619_v60  ;;  %645 = vmatprep.subr.bf16.mxu1 %v734_v3  ;;  %v219_v9 = vmul.f32 0.017857144, %v215_v48 }
  0x1e   :  { %v51_v10 = vadd.f32 %v50_v5, %v49_v63  ;;  %v57_v12 = vadd.f32 %v56_v6, %v55_v0  ;;  %v63_v13 = vadd.f32 %v62_v7, %v61_v1  ;;  %621 = vmatprep.subr.bf16.mxu0 %v734_v3  ;;  %vm173_vm4 = vcmask 257024  }
  0x1f   :  { %v247_v14 = vsel %vm95_vm1, %v217_v31, %v216_v29  ;;  %v64_v32 = vmul.f32 0.017857144, %v45_v8  ;;  %vm330_vm5 = vcmask 261120   ;;  %vm413_vm6 = vcmask 27648  }
  0x20   :  { %v248_v33 = vsel %vm97_vm2, %v218_v49, %v247_v14  ;;  %v65_v53 = vmul.f32 0.017857144, %v51_v10  ;;  %v66_v15 = vmul.f32 0.017857144, %v57_v12  ;;  %v67_v16 = vmul.f32 0.017857144, %v63_v13  ;;  %647 = vmatpush3.bf16.msra.mxu1 %v646_v61 }
  0x21   :  { %v249_v34 = vsel %vm99_vm3, %v219_v9, %v248_v33  ;;  %623 = vmatpush3.bf16.msra.mxu0 %v622_v62  ;;  %vm427_vm7 = vcmask 3072  }
  0x22   :  { %v96_v3 = vsel %vm95_vm1, %v65_v53, %v64_v32  ;;  %595 = vmatprep.subr.mxu0 %v736_v11 }
  0x23   :  { %v98_v35 = vsel %vm97_vm2, %v66_v15, %v96_v3  ;;  %593 = vmatmul.mubr.f32.vlgmr.msra.gmra.mrb[0].mxu1 %v249_v34 }
  0x24   :  { %v100_v60 = vsel %vm99_vm3, %v67_v16, %v98_v35 }
  0x25   :  { %558 = vmatmul.mubr.f32.vlgmr.msra.gmra.mrb[0].mxu0 %v100_v60 }
  0x26   :  { %597 = vmatprep.mubr.msk.f32.mxu0 %vm735_vm0, %v736_v11 }
  0xf6   :  { %v317_v38 = vpop.f32.mrb[0].mxu1 }
  0xf7   :  { %v318_v39 = vadd.f32 %v486_v36, %v317_v38  ;;  %v594_v61 = vpop.f32.mrb[1].mxu1 }
  0xf8   :  { %v168_v62 = vpop.f32.mrb[0].mxu0 }
  0xf9   :  { %v169_v17 = vadd.f32 %v485_v37, %v168_v62  ;;  %v559_v18 = vpop.f32.mrb[1].mxu0  ;;  %v321_v19 = vmul.f32 %v318_v39, %v318_v39 }
  0xfb   :  { %v172_v20 = vmul.f32 %v169_v17, %v169_v17  ;;  %v322_v21 = vsel %vm173_vm4, %v321_v19, 0.0 }
  0xfc   :  { %323 = vadd.xlane.f32.xlu0 %v322_v21 }
  0xfd   :  { %v174_v11 = vsel %vm173_vm4, %v172_v20, 0.0 }
 0x100   :  { %175 = vadd.xlane.f32.xlu0 %v174_v11 }
 0x189   :  { %v324_v22 = vpop.xlane.xlu0 %323 }
 0x18a   :  { %v325_v23 = vmax.f32 %v324_v22, 1e-24 }
 0x18c   :  { %656 = vrsqrt.f32 %v325_v23 }
 0x18d   :  { %v176_v24 = vpop.xlane.xlu0 %175 }
 0x18e   :  { %v177_v25 = vmax.f32 %v176_v24, 1e-24 }
 0x190   :  { %658 = vrsqrt.f32 %v177_v25 }
 0x196   :  { %v657_v26 = vpop.eup %656 }
 0x197   :  { %v327_v30 = vmul.f32 %v657_v26, %v318_v39 }
 0x199   :  { %596 = vmatpush3.xpose.msk.msra.mxu0 %vm330_vm5, %v327_v30  ;;  %329 = vst.msk [vmem:[#allocation6] sm:$0xf] %vm173_vm4, %v327_v30 }
 0x19a   :  { %v659_v40 = vpop.eup %658 }
 0x19b   :  { %v179_v41 = vmul.f32 %v659_v40, %v169_v17 }
 0x19d   :  { %598 = vmatmul.mubr.msk.f32.vlgmr.msra.gmra.mrb[2].mxu0 %vm330_vm5, %v179_v41  ;;  %328 = vst.msk [vmem:[#allocation4] sm:$0xf] %vm173_vm4, %v179_v41  ;;  %v408_v42 = vmul.f32 %v327_v30, %v179_v41 }
 0x19f   :  { %v409_v44 = vsel %vm173_vm4, %v408_v42, 0.0 }
 0x1a0   :  { %410 = vadd.xlane.f32.xlu0 %v409_v44 }
 0x22d   :  { %v411_v58 = vpop.xlane.xlu0 %410 }
 0x22e   :  { %v412_v63 = vmul.f32 14.285714, %v411_v58 }
 0x270   :  { %v403_v45 = vpop.f32.mrb[2].mxu0 }
 0x271   :  { %v407_v46 = vmul.f32 14.285714, %v403_v45  ;;  %v599_v50 = vpop.f32.mrb[3].mxu0 }
 0x273   :  { %v414_v51 = vsel %vm413_vm6, %v407_v46, -inf }
 0x274   :  { %415 = vmax.xlane.f32.xlu1 %v414_v51 }
 0x301   :  { %v416_v43 = vpop.xlane.xlu1 %415 }
 0x302   :  { %v417_v52 = vsub.f32 %v407_v46, %v416_v43 }
 0x304   :  { %v418_v54 = vmul.f32 1.442695, %v417_v52 }
 0x306   :  { %660 = vpow2.f32 %v418_v54 }
 0x310   :  { %v661_v55 = vpop.eup %660 }
 0x311   :  { %v420_v47 = vsel %vm413_vm6, %v661_v55, 0.0 }
 0x312   :  { %421 = vadd.xlane.f32.xlu1 %v420_v47 }
 0x39f   :  { %v422_v56 = vpop.xlane.xlu1 %421 }
 0x3a0   :  { %662 = vlog2.f32 %v422_v56 }
 0x3aa   :  { %v663_v57 = vpop.eup %662 }
 0x3ab   :  { %v424_v59 = vmul.f32 0.6931472, %v663_v57 }
 0x3ad   :  { %v425_v0 = vadd.f32 %v424_v59, %v416_v43 }
 0x3af   :  { %v426_v1 = vsub.f32 %v425_v0, %v412_v63 }
 0x3b1   :  { %v428_v2 = vsel %vm427_vm7, %v426_v1, 0.0 }
 0x3b2   :  { %429 = vadd.xlane.f32.xlu1 %v428_v2 }
 0x3b3   :  { %675 = shalt.err (!%p672_p4)
}
 0x3b4   :  { %s676_s14 = scalar_lea.hbm %s1081_s7, 64 }
 0x3b5   :  { %p677_p5 = scmp.ne.s32.totalorder %s1081_s7, %s676_s14  ;;  %p680_p6 = scmp.lt.u32.totalorder %s676_s14, %s1081_s7 }
 0x3b7   :  { %p682_p7 = pnand %p680_p6, %p677_p5 }
 0x3b9   :  { %685 = shalt.err (!%p682_p7)
}
 0x3ba   :  { %463 = dma.vmem_to_hbm [thread:$0]  %s461_s5, 64, %s1081_s7, [#allocation5]  }
 0x3bb   :  { %s738_s1 = smov [#allocation6]  }
 0x3bc   :  { %s470_s21 = sshll.u32 %s738_s1, 4  ;;  %s471_s21 = int_to_ptr.vmem [resolvable:$true] %s470_s21 }
 0x3bd   :  { %s686_s22 = scalar_lea.vmem %s471_s21, 64  ;;  %p691_p9 = scmp.lt.s32.totalorder %s471_s21, %s471_s21 }
 0x3be   :  { %p687_p8 = scmp.ne.s32.totalorder %s471_s21, %s686_s22  ;;  %p692_p10 = scmp.lt.s32.totalorder %s686_s22, %s686_s22 }
 0x3c0   :  { %p693_p11 = por %p692_p10, %p691_p9 }
 0x3c2   :  { %p694_p12 = pnand %p693_p11, %p687_p8 }
 0x3c4   :  { %697 = shalt.err (!%p694_p12)
}
 0x3c5   :  { %s698_s25 = scalar_lea.hbm %s1082_s8, 64 }
 0x3c6   :  { %p699_p13 = scmp.ne.s32.totalorder %s1082_s8, %s698_s25  ;;  %p702_p0 = scmp.lt.u32.totalorder %s698_s25, %s1082_s8 }
 0x3c8   :  { %p704_p1 = pnand %p702_p0, %p699_p13 }
 0x3ca   :  { %707 = shalt.err (!%p704_p1)
}
 0x3cb   :  { %473 = dma.vmem_to_hbm [thread:$0]  %s471_s21, 64, %s1082_s8, [#allocation5]   ;;  %vm442_vm8 = vcmask 0  }
 0x3cc   :  { %s739_s2 = smov [#allocation2]  }
 0x3cd   :  { %s450_s0 = sshll.u32 %s739_s2, 4  ;;  %s451_s0 = int_to_ptr.vmem [resolvable:$true] %s450_s0 }
 0x3ce   :  { %s708_s10 = scalar_lea.vmem %s451_s0, 16  ;;  %s712_s3 = scalar_lea.vmem %s451_s0, 32 }
 0x3cf   :  { %p709_p2 = scmp.ne.s32.totalorder %s451_s0, %s708_s10  ;;  %p713_p3 = scmp.lt.s32.totalorder %s451_s0, %s451_s0 }
 0x3d0   :  { %p714_p4 = scmp.lt.s32.totalorder %s712_s3, %s708_s10 }
 0x3d2   :  { %p715_p5 = por %p714_p4, %p713_p3 }
 0x3d4   :  { %p716_p6 = pnand %p715_p5, %p709_p2 }
 0x43f   :  { %v430_v4 = vpop.xlane.xlu1 %429 }
 0x440   :  { %v431_v27 = vrot.slane %v430_v4, 4 }
 0x442   :  { %v432_v28 = vadd.f32 %v431_v27, %v430_v4 }
 0x444   :  { %v433_v48 = vrot.slane %v432_v28, 2 }
 0x446   :  { %v434_v5 = vadd.f32 %v433_v48, %v432_v28 }
 0x448   :  { %v435_v6 = vrot.slane %v434_v5, 1 }
 0x44a   :  { %v436_v7 = vadd.f32 %v435_v6, %v434_v5 }
 0x44c   :  { %648 = vpush %v436_v7 }
 0x47d   :  { %s649_s30 = spop %648 }
 0x47e   :  { %s440_s9 = smul.f32 0.25, %s649_s30 }
 0x480   :  { %v441_v29 = vstv %s440_s9 }
 0x481   :  { %443 = vst.msk [vmem:[#allocation2] sm:$0x1] %vm442_vm8, %v441_v29 }
 0x482   :  { %719 = shalt.err (!%p716_p6)
}
 0x483   :  { %s720_s11 = scalar_lea.hbm %s1080_s6, 16 }
 0x484   :  { %p721_p7 = scmp.ne.s32.totalorder %s1080_s6, %s720_s11  ;;  %p724_p8 = scmp.lt.u32.totalorder %s720_s11, %s1080_s6 }
 0x486   :  { %p726_p9 = pnand %p724_p8, %p721_p7 }
 0x488   :  { %729 = shalt.err (!%p726_p9)
}
 0x489   :  { %453 = dma.vmem_to_hbm [thread:$0]  %s451_s0, 16, %s1080_s6, [#allocation3]  }
 0x48a   :  { %730 = dma.done.wait [#allocation3], 16  }
 0x48b   :  { %731 = vsyncadd [#allocation3], 4294967280 }
 0x48c   :  { %732 = dma.done.wait [#allocation5], 128  }
 0x48d   :  { %733 = vsyncadd [#allocation5], 4294967168 }
 0x48e   :  { %483 = vsyncpa [#allocation3], 1 }
 0x48f   :  { %484 = vsyncpa [#allocation5], 1 }

</bundles_post_ra>
